<compile_context>
chip_gen: v5e
topology: v5e:2x2
jax: 0.10.0
libtpu: 0.0.40
codegen_flags: <defaults>
</compile_context>

<pallas_src>
import functools

import jax
import jax.numpy as jnp
from jax.experimental import pallas as pl
from jax.experimental.pallas import tpu as pltpu

_EPS = 1e-6          # matches torch pairwise_distance default eps
_LANES = 128
_SUBLANES = 8
_MIN_ROWS = 256      # target rows/tile before we start tiling the feature axis


def _round_up(x, m):
    return ((x + m - 1) // m) * m


def _triplet_loss_kernel(a_ref, p_ref, n_ref, o_ref, pos_acc, neg_acc, *,
                         margin, batch, feat, tile_rows, tile_d,
                         mask_rows, mask_cols):
    """Grid = (batch tiles ["parallel"], feature tiles ["arbitrary" reduction])."""
    i = pl.program_id(0)                      # batch-tile index
    j = pl.program_id(1)                      # feature-tile index (reduction)

    @pl.when(j == 0)
    def _():
        pos_acc[...] = jnp.zeros_like(pos_acc)
        neg_acc[...] = jnp.zeros_like(neg_acc)

    # f32 compute regardless of storage dtype (bf16 storage halves HBM traffic).
    a = a_ref[...].astype(jnp.float32)
    p = p_ref[...].astype(jnp.float32)
    n = n_ref[...].astype(jnp.float32)

    # pairwise_distance adds eps to the difference before taking the norm.
    dp = a - p + _EPS
    dn = a - n + _EPS
    dp2 = dp * dp
    dn2 = dn * dn

    if mask_cols:
        # Padding columns of a partial last feature tile must contribute 0
        # (NOT eps**2) to the sum of squares.
        col = j * tile_d + jax.lax.broadcasted_iota(jnp.int32, (1, tile_d), 1)
        valid = col < feat                    # (1, tile_d), broadcast over rows
        dp2 = jnp.where(valid, dp2, 0.0)
        dn2 = jnp.where(valid, dn2, 0.0)

    pos_acc[...] += jnp.sum(dp2, axis=-1, keepdims=True)     # (tile_rows, 1)
    neg_acc[...] += jnp.sum(dn2, axis=-1, keepdims=True)

    @pl.when(j == pl.num_programs(1) - 1)
    def _():
        pos_d = jnp.sqrt(pos_acc[...])
        neg_d = jnp.sqrt(neg_acc[...])
        hinge = jnp.maximum(pos_d - neg_d + margin, 0.0)      # (tile_rows, 1)
        if mask_rows:
            # Rows past the true batch size hold unspecified padding; mask
            # BEFORE the sum (where selects, so inf/nan never reach it).
            row = i * tile_rows + jax.lax.broadcasted_iota(
                jnp.int32, (tile_rows, 1), 0)
            hinge = jnp.where(row < batch, hinge, 0.0)
        partial = jnp.sum(hinge)
        # Fully (8,128)-aligned, lane-dense store of the per-tile partial sum.
        o_ref[...] = jnp.full((1, _SUBLANES, _LANES), partial, dtype=jnp.float32)


def _plan_tiling(B, D, itemsize):
    """Pick (tile_rows, tile_d, vmem_limit_bytes) from the chip's VMEM size.

    VMEM accounting per tile element:
      3 inputs x 2 pipeline buffers in the storage dtype
      + 32 B headroom for the f32 temporaries (upcasts, diffs, squares).
    """
    try:
        info = pltpu.get_tpu_info()
        vmem_cap = int(getattr(info, "vmem_capacity_bytes", 0)) or 64 * 1024 * 1024
    except Exception:
        vmem_cap = 64 * 1024 * 1024           # conservative fallback (v7x per-TC)

    # ~75% of physical VMEM: 96 MiB on v5e/v6e (128 MiB), 48 MiB on v7x (64 MiB).
    vmem_limit = min((vmem_cap * 3) // 4, 96 * 1024 * 1024)

    bytes_per_elem = 6 * itemsize + 32
    budget = max(vmem_limit - 4 * 1024 * 1024, 4 * 1024 * 1024)
    max_elems = max(budget // bytes_per_elem, _SUBLANES * _LANES)

    # Keep the feature axis whole while >= _MIN_ROWS rows still fit; otherwise
    # tile D in lane-aligned chunks (the reduction axis is the last grid axis).
    if D * _MIN_ROWS <= max_elems:
        tile_d = D
    else:
        tile_d = max(_LANES, ((max_elems // _MIN_ROWS) // _LANES) * _LANES)
        tile_d = min(tile_d, _round_up(D, _LANES))

    rows = max(_SUBLANES, (max_elems // tile_d // _SUBLANES) * _SUBLANES)
    rows = min(rows, _round_up(B, _SUBLANES))

    # Guarantee >= 2 batch tiles whenever possible so the "parallel" axis can
    # feed both TensorCores on v7x (costs nothing on single-TC v5e/v6e).
    if rows >= B and B > _SUBLANES:
        rows = max(_SUBLANES, _round_up((B + 1) // 2, _SUBLANES))

    return rows, tile_d, vmem_limit


def triplet_loss(anchor, positive, negative, margin=1.0, *,
                 tile_rows=None, tile_d=None):
    """anchor/positive/negative: (B, D) arrays (f32 or bf16). Returns scalar f32."""
    assert anchor.shape == positive.shape == negative.shape
    assert anchor.ndim == 2
    B, D = anchor.shape
    itemsize = jnp.dtype(anchor.dtype).itemsize

    auto_rows, auto_d, vmem_limit = _plan_tiling(B, D, itemsize)
    tb = int(tile_rows) if tile_rows is not None else auto_rows
    td = int(tile_d) if tile_d is not None else auto_d

    nb = pl.cdiv(B, tb)
    nd = pl.cdiv(D, td)

    kernel = functools.partial(
        _triplet_loss_kernel,
        margin=float(margin), batch=B, feat=D,
        tile_rows=tb, tile_d=td,
        mask_rows=(B % tb != 0), mask_cols=(D % td != 0))

    in_spec = pl.BlockSpec((tb, td), lambda i, j: (i, j))
    out_spec = pl.BlockSpec((1, _SUBLANES, _LANES), lambda i, j: (i, 0, 0))

    cost = pl.CostEstimate(
        flops=int(10 * B * D + 8 * B),
        transcendentals=int(2 * B),
        bytes_accessed=int(3 * B * D * itemsize + nb * _SUBLANES * _LANES * 4))

    partials = pl.pallas_call(
        kernel,
        out_shape=jax.ShapeDtypeStruct((nb, _SUBLANES, _LANES), jnp.float32),
        grid=(nb, nd),
        in_specs=[in_spec, in_spec, in_spec],
        out_specs=out_spec,
        scratch_shapes=[pltpu.VMEM((tb, 1), jnp.float32),
                        pltpu.VMEM((tb, 1), jnp.float32)],
        compiler_params=pltpu.CompilerParams(
            dimension_semantics=("parallel", "arbitrary"),
            vmem_limit_bytes=int(vmem_limit)),
        cost_estimate=cost,
    )(anchor, positive, negative)

    # Each batch tile wrote its partial sum replicated over the 8x128 block;
    # finish the mean with the true global batch size (exact up to fp rounding).
    return jnp.sum(partials) / (B * _SUBLANES * _LANES)


def _reference(anchor, positive, negative, margin=1.0):
    a = anchor.astype(jnp.float32)
    p = positive.astype(jnp.float32)
    n = negative.astype(jnp.float32)
    pos_d = jnp.sqrt(jnp.sum((a - p + _EPS) ** 2, axis=-1))
    neg_d = jnp.sqrt(jnp.sum((a - n + _EPS) ** 2, axis=-1))
    return jnp.mean(jnp.maximum(pos_d - neg_d + margin, 0.0))


if __name__ == "__main__":
    key = jax.random.PRNGKey(0)

    # Test 1: small embedding batch consistent with the module's forward (f32).
    ka, kp, kn = jax.random.split(key, 3)
    B, D = 8, 32
    anchor = jax.random.normal(ka, (B, D), dtype=jnp.float32)
    positive = jax.random.normal(kp, (B, D), dtype=jnp.float32)
    negative = jax.random.normal(kn, (B, D), dtype=jnp.float32)
    loss = jax.block_until_ready(triplet_loss(anchor, positive, negative, margin=1.0))
    ref = _reference(anchor, positive, negative, margin=1.0)
    assert jnp.allclose(loss, ref, atol=1e-5, rtol=1e-5), (loss, ref)

    # Test 2: batch not a multiple of the tile -> multi-tile "parallel" axis
    # (>= 2 tiles for v7x), partial-last-tile row masking, global-B mean.
    k2a, k2p, k2n = jax.random.split(jax.random.PRNGKey(1), 3)
    B2, D2 = 50, 160
    a2 = jax.random.normal(k2a, (B2, D2), dtype=jnp.float32)
    p2 = jax.random.normal(k2p, (B2, D2), dtype=jnp.float32)
    n2 = jax.random.normal(k2n, (B2, D2), dtype=jnp.float32)
    loss2 = jax.block_until_ready(triplet_loss(a2, p2, n2, margin=0.5))
    ref2 = _reference(a2, p2, n2, margin=0.5)
    assert jnp.allclose(loss2, ref2, atol=1e-5, rtol=1e-5), (loss2, ref2)

    # Test 3: bf16 storage (halves HBM traffic), f32 compute inside the kernel.
    a3, p3, n3 = (x.astype(jnp.bfloat16) for x in (a2, p2, n2))
    loss3 = jax.block_until_ready(triplet_loss(a3, p3, n3, margin=0.5))
    ref3 = _reference(a3, p3, n3, margin=0.5)
    assert jnp.allclose(loss3, ref3, atol=1e-5, rtol=1e-5), (loss3, ref3)

    # Test 4: force the D-tiled (two-axis) path at a small shape: partial last
    # feature tile (column mask) + partial last batch tile (row mask).
    k4a, k4p, k4n = jax.random.split(jax.random.PRNGKey(2), 3)
    B4, D4 = 20, 300
    a4 = jax.random.normal(k4a, (B4, D4), dtype=jnp.float32)
    p4 = jax.random.normal(k4p, (B4, D4), dtype=jnp.float32)
    n4 = jax.random.normal(k4n, (B4, D4), dtype=jnp.float32)
    loss4 = jax.block_until_ready(
        triplet_loss(a4, p4, n4, margin=1.0, tile_rows=16, tile_d=128))
    ref4 = _reference(a4, p4, n4, margin=1.0)
    assert jnp.allclose(loss4, ref4, atol=1e-5, rtol=1e-5), (loss4, ref4)

    print("KERNEL_OK")
</pallas_src>

<mosaic_0001>
module attributes {stable_mosaic.version = 11 : i64} {
  func.func @_triplet_loss_kernel(%arg0: i32, %arg1: i32, %arg2: memref<8x32xf32, #tpu.memory_space<vmem>>, %arg3: memref<8x32xf32, #tpu.memory_space<vmem>>, %arg4: memref<8x32xf32, #tpu.memory_space<vmem>>, %arg5: memref<1x8x128xf32, #tpu.memory_space<vmem>>, %arg6: memref<8x1xf32, #tpu.memory_space<vmem>>, %arg7: memref<8x1xf32, #tpu.memory_space<vmem>>) attributes {dimension_semantics = [#tpu.dimension_semantics<parallel>, #tpu.dimension_semantics<arbitrary>], iteration_bounds = array<i64: 1, 1>, scalar_prefetch = 0 : i64, scratch_operands = 2 : i64, tpu.core_type = #tpu.core_type<tc>, window_params = [{transform_indices = @transform_0, window_bounds = array<i64: 8, 32>}, {transform_indices = @transform_1, window_bounds = array<i64: 8, 32>}, {transform_indices = @transform_2, window_bounds = array<i64: 8, 32>}, {transform_indices = @transform_3, window_bounds = array<i64: 1, 8, 128>}]} {
    %c0_i32 = arith.constant 0 : i32
    %0 = arith.cmpi eq, %arg1, %c0_i32 : i32
    %1 = arith.extui %0 : i1 to i32
    %c0_i32_0 = arith.constant 0 : i32
    %2 = arith.cmpi ne, %1, %c0_i32_0 : i32
    scf.if %2 {
      %cst_19 = arith.constant 0.000000e+00 : f32
      %27 = vector.broadcast %cst_19 : f32 to vector<8x1xf32>
      %c0_20 = arith.constant 0 : index
      %c0_21 = arith.constant 0 : index
      %28 = vector.load %arg6[%c0_20, %c0_21] : memref<8x1xf32, #tpu.memory_space<vmem>>, vector<8x1xf32>
      tpu.vector_store %arg6[%c0_20, %c0_21], %27 {strides = array<i32>} : memref<8x1xf32, #tpu.memory_space<vmem>>, vector<8x1xf32>,
      %cst_22 = arith.constant 0.000000e+00 : f32
      %29 = vector.broadcast %cst_22 : f32 to vector<8x1xf32>
      %c0_23 = arith.constant 0 : index
      %c0_24 = arith.constant 0 : index
      %30 = vector.load %arg7[%c0_23, %c0_24] : memref<8x1xf32, #tpu.memory_space<vmem>>, vector<8x1xf32>
      tpu.vector_store %arg7[%c0_23, %c0_24], %29 {strides = array<i32>} : memref<8x1xf32, #tpu.memory_space<vmem>>, vector<8x1xf32>,
    } else {
    }
    %c0 = arith.constant 0 : index
    %c0_1 = arith.constant 0 : index
    %3 = vector.load %arg2[%c0, %c0_1] : memref<8x32xf32, #tpu.memory_space<vmem>>, vector<8x32xf32>
    %c0_2 = arith.constant 0 : index
    %c0_3 = arith.constant 0 : index
    %4 = vector.load %arg3[%c0_2, %c0_3] : memref<8x32xf32, #tpu.memory_space<vmem>>, vector<8x32xf32>
    %c0_4 = arith.constant 0 : index
    %c0_5 = arith.constant 0 : index
    %5 = vector.load %arg4[%c0_4, %c0_5] : memref<8x32xf32, #tpu.memory_space<vmem>>, vector<8x32xf32>
    %6 = arith.subf %3, %4 : vector<8x32xf32>
    %cst = arith.constant 9.99999997E-7 : f32
    %7 = vector.broadcast %cst : f32 to vector<8x32xf32>
    %8 = arith.addf %6, %7 : vector<8x32xf32>
    %9 = arith.subf %3, %5 : vector<8x32xf32>
    %cst_6 = arith.constant 9.99999997E-7 : f32
    %10 = vector.broadcast %cst_6 : f32 to vector<8x32xf32>
    %11 = arith.addf %9, %10 : vector<8x32xf32>
    %12 = arith.mulf %8, %8 : vector<8x32xf32>
    %13 = arith.mulf %11, %11 : vector<8x32xf32>
    %c0_7 = arith.constant 0 : index
    %c0_8 = arith.constant 0 : index
    %14 = vector.load %arg6[%c0_7, %c0_8] : memref<8x1xf32, #tpu.memory_space<vmem>>, vector<8x1xf32>
    %cst_9 = arith.constant dense<0.000000e+00> : vector<8xf32>
    %15 = vector.multi_reduction <add>, %12, %cst_9 [1] : vector<8x32xf32> to vector<8xf32>
    %16 = vector.shape_cast %15 : vector<8xf32> to vector<8x1xf32>
    %17 = arith.addf %14, %16 : vector<8x1xf32>
    %c0_10 = arith.constant 0 : index
    %c0_11 = arith.constant 0 : index
    %18 = vector.load %arg6[%c0_10, %c0_11] : memref<8x1xf32, #tpu.memory_space<vmem>>, vector<8x1xf32>
    tpu.vector_store %arg6[%c0_10, %c0_11], %17 {strides = array<i32>} : memref<8x1xf32, #tpu.memory_space<vmem>>, vector<8x1xf32>,
    %c0_12 = arith.constant 0 : index
    %c0_13 = arith.constant 0 : index
    %19 = vector.load %arg7[%c0_12, %c0_13] : memref<8x1xf32, #tpu.memory_space<vmem>>, vector<8x1xf32>
    %cst_14 = arith.constant dense<0.000000e+00> : vector<8xf32>
    %20 = vector.multi_reduction <add>, %13, %cst_14 [1] : vector<8x32xf32> to vector<8xf32>
    %21 = vector.shape_cast %20 : vector<8xf32> to vector<8x1xf32>
    %22 = arith.addf %19, %21 : vector<8x1xf32>
    %c0_15 = arith.constant 0 : index
    %c0_16 = arith.constant 0 : index
    %23 = vector.load %arg7[%c0_15, %c0_16] : memref<8x1xf32, #tpu.memory_space<vmem>>, vector<8x1xf32>
    tpu.vector_store %arg7[%c0_15, %c0_16], %22 {strides = array<i32>} : memref<8x1xf32, #tpu.memory_space<vmem>>, vector<8x1xf32>,
    %c0_i32_17 = arith.constant 0 : i32
    %24 = arith.cmpi eq, %arg1, %c0_i32_17 : i32
    %25 = arith.extui %24 : i1 to i32
    %c0_i32_18 = arith.constant 0 : i32
    %26 = arith.cmpi ne, %25, %c0_i32_18 : i32
    scf.if %26 {
      %c0_19 = arith.constant 0 : index
      %c0_20 = arith.constant 0 : index
      %27 = vector.load %arg6[%c0_19, %c0_20] : memref<8x1xf32, #tpu.memory_space<vmem>>, vector<8x1xf32>
      %28 = math.sqrt %27 : vector<8x1xf32>
      %c0_21 = arith.constant 0 : index
      %c0_22 = arith.constant 0 : index
      %29 = vector.load %arg7[%c0_21, %c0_22] : memref<8x1xf32, #tpu.memory_space<vmem>>, vector<8x1xf32>
      %30 = math.sqrt %29 : vector<8x1xf32>
      %31 = arith.subf %28, %30 : vector<8x1xf32>
      %cst_23 = arith.constant 1.000000e+00 : f32
      %32 = vector.broadcast %cst_23 : f32 to vector<8x1xf32>
      %33 = arith.addf %31, %32 : vector<8x1xf32>
      %cst_24 = arith.constant 0.000000e+00 : f32
      %34 = vector.broadcast %cst_24 : f32 to vector<8x1xf32>
      %35 = arith.maximumf %33, %34 : vector<8x1xf32>
      %36 = vector.shape_cast %35 : vector<8x1xf32> to vector<1x8x1xf32>
      %cst_25 = arith.constant dense<0.000000e+00> : vector<1xf32>
      %37 = vector.multi_reduction <add>, %36, %cst_25 [1, 2] : vector<1x8x1xf32> to vector<1xf32>
      %38 = vector.shape_cast %37 : vector<1xf32> to vector<1x1x1xf32>
      %39 = vector.extract %38[0, 0, 0] : f32 from vector<1x1x1xf32>
      %40 = vector.broadcast %39 : f32 to vector<1x8x128xf32>
      %c0_26 = arith.constant 0 : index
      %c0_27 = arith.constant 0 : index
      %c0_28 = arith.constant 0 : index
      %41 = vector.load %arg5[%c0_26, %c0_27, %c0_28] : memref<1x8x128xf32, #tpu.memory_space<vmem>>, vector<1x8x128xf32>
      tpu.vector_store %arg5[%c0_26, %c0_27, %c0_28], %40 {strides = array<i32>} : memref<1x8x128xf32, #tpu.memory_space<vmem>>, vector<1x8x128xf32>,
    } else {
    }
    return
  }
  func.func @transform_0(%arg0: i32, %arg1: i32) -> (i32, i32) {
    %c0_i32 = arith.constant 0 : i32
    return %arg0, %arg1 : i32, i32
  }
  func.func @transform_1(%arg0: i32, %arg1: i32) -> (i32, i32) {
    %c0_i32 = arith.constant 0 : i32
    return %arg0, %arg1 : i32, i32
  }
  func.func @transform_2(%arg0: i32, %arg1: i32) -> (i32, i32) {
    %c0_i32 = arith.constant 0 : i32
    return %arg0, %arg1 : i32, i32
  }
  func.func @transform_3(%arg0: i32, %arg1: i32) -> (i32, i32, i32) {
    %c0_i32 = arith.constant 0 : i32
    %c0_i32_0 = arith.constant 0 : i32
    %c0_i32_1 = arith.constant 0 : i32
    return %arg0, %c0_i32, %c0_i32_0 : i32, i32, i32
  }
}

</mosaic_0001>

<bundles_post_ra>
// kernel: tpu_custom_call.1
= control target key start
LH: loop header
LB: loop body
LE: loop exit
PB: predicated region body
PF: predicated region fallthrough
CT: control target
= control target key end

     0   :  { %8 = vsyncpa [#allocation5], 0  ;;  %s303_s0 = inlined_call_operand.hbm [shape: f32[8,32], index: 0, kind: input, shape index: {}]   ;;  %s304_s1 = inlined_call_operand.hbm [shape: f32[8,32], index: 1, kind: input, shape index: {}]   ;;  %s305_s2 = inlined_call_operand.hbm [shape: f32[8,32], index: 2, kind: input, shape index: {}]   ;;  %s306_s3 = inlined_call_operand.hbm [shape: f32[1,8,128], index: 3, kind: output, shape index: {}]  }
   0x1   :  { %9 = vsyncpa [#allocation8], 0  ;;  %s27_s14 = sshll.u32 %s304_s1, 4  ;;  %s28_s14 = int_to_ptr.hbm [resolvable:$true] %s27_s14 }
   0x2   :  { %10 = vsyncpa [#allocation6], 0  ;;  %s261_s15 = smov [#allocation7]   ;;  %s16_s19 = sshll.u32 %s303_s0, 4  ;;  %s17_s19 = int_to_ptr.hbm [resolvable:$true] %s16_s19 }
   0x3   :  { %s29_s16 = sshll.u32 %s261_s15, 4  ;;  %s262_s20 = smov [#allocation4]   ;;  %s30_s16 = int_to_ptr.vmem [resolvable:$true] %s29_s16 }
   0x4   :  { %32 = dma.hbm_to_vmem [thread:$0]  %s28_s14, 128, %s30_s16, [#allocation8]  }
   0x5   :  { %s18_s21 = sshll.u32 %s262_s20, 4  ;;  %s38_s24 = sshll.u32 %s305_s2, 4  ;;  %s19_s21 = int_to_ptr.vmem [resolvable:$true] %s18_s21  ;;  %s39_s24 = int_to_ptr.hbm [resolvable:$true] %s38_s24 }
   0x6   :  { %21 = dma.hbm_to_vmem [thread:$0]  %s17_s19, 128, %s19_s21, [#allocation5]  }
   0x7   :  { %s263_s1 = smov [#allocation9]  }
   0x8   :  { %s40_s25 = sshll.u32 %s263_s1, 4  ;;  %s41_s25 = int_to_ptr.vmem [resolvable:$true] %s40_s25 }
   0x9   :  { %43 = dma.hbm_to_vmem [thread:$0]  %s39_s24, 128, %s41_s25, [#allocation8]  }
   0xa   :  { %255 = dma.done.wait [#allocation5], 128  }
   0xb   :  { %256 = vsyncadd [#allocation5], 4294967168 }
   0xc   :  { %257 = dma.done.wait [#allocation8], 256  }
   0xd   :  { %258 = vsyncadd [#allocation8], 4294967040  ;;  %vm60_vm0 = vcmask 7168   ;;  %v264_v0 = vmov 0.0   ;;  %v63_v1 = vld [vmem:[#allocation4] sm:$0xff]  ;;  %v64_v2 = vld [vmem:[#allocation7] sm:$0xff] }
   0xe   :  { %61 = vst.msk [vmem:[#allocation2] sm:$0xff] %vm60_vm0, %v264_v0  ;;  %v65_v3 = vld [vmem:[#allocation9] sm:$0xff]  ;;  %v66_v4 = vsub.f32 %v63_v1, %v64_v2  ;;  %vm73_vm1 = vcmask 261120   ;;  %s265_s0 = smov [#allocation10]   ;;  %s137_s28 = sshll.u32 %s306_s3, 4  ;;  %s138_s28 = int_to_ptr.hbm [resolvable:$true] %s137_s28 }
   0xf   :  { %62 = vst.msk [vmem:[#allocation3] sm:$0xff] %vm60_vm0, %v264_v0  ;;  %v68_v5 = vsub.f32 %v63_v1, %v65_v3  ;;  %s135_s2 = sshll.u32 %s265_s0, 4  ;;  %s136_s2 = int_to_ptr.vmem [resolvable:$true] %s135_s2 }
  0x10   :  { %v67_v6 = vadd.f32 1e-06, %v66_v4 }
  0x11   :  { %v69_v8 = vadd.f32 1e-06, %v68_v5 }
  0x12   :  { %v70_v7 = vmul.f32 %v67_v6, %v67_v6 }
  0x13   :  { %v71_v10 = vmul.f32 %v69_v8, %v69_v8 }
  0x14   :  { %v74_v9 = vsel %vm73_vm1, %v70_v7, 0.0 }
  0x15   :  { %75 = vadd.xlane.f32.xlu0 %v74_v9  ;;  %v81_v11 = vsel %vm73_vm1, %v71_v10, 0.0  ;;  %v72_v12 = vld [vmem:[#allocation2] sm:$0xff] }
  0x16   :  { %v80_v15 = vld [vmem:[#allocation3] sm:$0xff] }
  0x1d   :  { %82 = vadd.xlane.f32.xlu0 %v81_v11 }
  0x88   :  { %v76_v13 = vpop.xlane.xlu0 %75 }
  0x89   :  { %v77_v14 = vadd.f32 %v76_v13, %v72_v12 }
  0x8b   :  { %79 = vst.msk [vmem:[#allocation2] sm:$0xff] %vm60_vm0, %v77_v14 }
  0x90   :  { %v83_v16 = vpop.xlane.xlu0 %82 }
  0x91   :  { %v84_v17 = vadd.f32 %v83_v16, %v80_v15 }
  0x92   :  { %v89_v18 = vld [vmem:[#allocation2] sm:$0xff] }
  0x93   :  { %85 = vst.msk [vmem:[#allocation3] sm:$0xff] %vm60_vm0, %v84_v17  ;;  %155 = vrsqrt.f32 %v89_v18  ;;  %vm97_vm2 = vcmp.eq.f32.partialorder %v89_v18, inf  ;;  %v100_v35 = vand.u32 2147483648, %v89_v18  ;;  %vm99_vm4 = vcmp.eq.f32.partialorder %v89_v18, 0.0 }
  0x99   :  { %v156_v19 = vpop.eup %155 }
  0x9a   :  { %v91_v20 = vmul.f32 %v156_v19, %v89_v18  ;;  %v102_v21 = vld [vmem:[#allocation3] sm:$0xff] }
  0x9b   :  { %157 = vrsqrt.f32 %v102_v21  ;;  %vm110_vm3 = vcmp.eq.f32.partialorder %v102_v21, inf  ;;  %v113_v36 = vand.u32 2147483648, %v102_v21  ;;  %vm112_vm5 = vcmp.eq.f32.partialorder %v102_v21, 0.0 }
  0x9c   :  { %v92_v22 = vmul.f32 %v156_v19, %v91_v20 }
  0x9e   :  { %v93_v23 = vmul.f32 0.5, %v92_v22 }
  0xa0   :  { %v94_v24 = vsub.f32 1.5, %v93_v23 }
  0xa1   :  { %v158_v25 = vpop.eup %157 }
  0xa2   :  { %v104_v26 = vmul.f32 %v158_v25, %v102_v21  ;;  %v95_v27 = vmul.f32 %v156_v19, %v94_v24 }
  0xa4   :  { %v105_v28 = vmul.f32 %v158_v25, %v104_v26  ;;  %v96_v30 = vmul.f32 %v95_v27, %v89_v18 }
  0xa6   :  { %v106_v29 = vmul.f32 0.5, %v105_v28  ;;  %v98_v33 = vsel %vm97_vm2, %v89_v18, %v96_v30 }
  0xa7   :  { %v101_v38 = vsel %vm99_vm4, %v100_v35, %v98_v33 }
  0xa8   :  { %v107_v31 = vsub.f32 1.5, %v106_v29 }
  0xaa   :  { %v108_v32 = vmul.f32 %v158_v25, %v107_v31 }
  0xac   :  { %v109_v34 = vmul.f32 %v108_v32, %v102_v21 }
  0xae   :  { %v111_v37 = vsel %vm110_vm3, %v102_v21, %v109_v34 }
  0xaf   :  { %v114_v39 = vsel %vm112_vm5, %v113_v36, %v111_v37 }
  0xb0   :  { %v115_v40 = vsub.f32 %v101_v38, %v114_v39 }
  0xb2   :  { %v116_v41 = vadd.f32 1.0, %v115_v40 }
  0xb4   :  { %v117_v42 = vmax.f32 %v116_v41, 0.0 }
  0xb6   :  { %v118_v43 = vsel %vm60_vm0, %v117_v42, 0.0 }
  0xb7   :  { %119 = vadd.xlane.f32.xlu1 %v118_v43 }
 0x12a   :  { %v120_v44 = vpop.xlane.xlu1 %119 }
 0x12b   :  { %v121_v45 = vrot.slane %v120_v44, 4 }
 0x12d   :  { %v122_v46 = vadd.f32 %v121_v45, %v120_v44 }
 0x12f   :  { %v123_v47 = vrot.slane %v122_v46, 2 }
 0x131   :  { %v124_v48 = vadd.f32 %v123_v47, %v122_v46 }
 0x133   :  { %v125_v49 = vrot.slane %v124_v48, 1 }
 0x135   :  { %v126_v50 = vadd.f32 %v125_v49, %v124_v48 }
 0x137   :  { %148 = vpush %v126_v50 }
 0x168   :  { %s149_s29 = spop %148 }
 0x169   :  { %v128_v51 = vstv %s149_s29 }
 0x16a   :  { %129 = vst [vmem:[#allocation10] sm:$0xff] %v128_v51 }
 0x16b   :  { %140 = dma.vmem_to_hbm [thread:$0]  %s136_s2, 128, %s138_s28, [#allocation6]  }
 0x16c   :  { %259 = dma.done.wait [#allocation6], 128  }
 0x16d   :  { %260 = vsyncadd [#allocation6], 4294967168 }
 0x16e   :  { %145 = vsyncpa [#allocation5], 1 }
 0x16f   :  { %146 = vsyncpa [#allocation8], 1 }
 0x170   :  { %147 = vsyncpa [#allocation6], 1 }

</bundles_post_ra>
